<compile_context>
chip_gen: v7x
topology: tpu7x:2x2x1
jax: 0.10.0
libtpu: 0.0.40
codegen_flags: <defaults>
</compile_context>

<pallas_src>
import jax
import jax.numpy as jnp
from jax.experimental import pallas as pl
from jax.experimental.pallas import tpu as pltpu

NUM_CLASSES = 5
F_IN, H1, H2 = 512, 256, 128
# Final layer padded up to 128 output lanes for a lane-dense (unmasked) store;
# the wrapper slices back down to NUM_CLASSES.
OUT_PAD = 128
# Max batch-tile rows per grid step.
TB_MAX = 1024


def _round_up(n, m):
    return -(-n // m) * m


def mlp_head_kernel(x_ref, w1_ref, b1_ref, w2_ref, b2_ref, w3_ref, b3_ref, o_ref):
    # x arrives f32 and is cast to bf16 in-kernel (no extra wrapper HBM pass).
    # MXU dots take bf16 inputs and accumulate in f32; bias-add + ReLU run in
    # f32 on the VPU; activations are cast back to bf16 for the next matmul.
    x = x_ref[...].astype(jnp.bfloat16)                                 # [TB, 512]
    h1 = jnp.dot(x, w1_ref[...], preferred_element_type=jnp.float32)
    h1 = jnp.maximum(h1 + b1_ref[...], 0.0)                             # f32 [TB, 256]
    # Dropout(p=0.5) is identity in eval mode.
    h2 = jnp.dot(h1.astype(jnp.bfloat16), w2_ref[...],
                 preferred_element_type=jnp.float32)
    h2 = jnp.maximum(h2 + b2_ref[...], 0.0)                             # f32 [TB, 128]
    logits = jnp.dot(h2.astype(jnp.bfloat16), w3_ref[...],
                     preferred_element_type=jnp.float32) + b3_ref[...]  # f32 [TB, 128]
    o_ref[...] = logits.astype(o_ref.dtype)                             # bf16 store


def prepare_params(params):
    """One-time parameter prep: pad the last layer to OUT_PAD lanes and cast
    weights to bf16 (biases stay f32; they are added in f32 inside the kernel)."""
    w1, b1, w2, b2, w3, b3 = params
    w3p = jnp.zeros((H2, OUT_PAD), jnp.float32).at[:, :NUM_CLASSES].set(w3)
    b3p = jnp.zeros((OUT_PAD,), jnp.float32).at[:NUM_CLASSES].set(b3)
    return (
        w1.astype(jnp.bfloat16), b1.reshape(1, H1).astype(jnp.float32),
        w2.astype(jnp.bfloat16), b2.reshape(1, H2).astype(jnp.float32),
        w3p.astype(jnp.bfloat16), b3p.reshape(1, OUT_PAD).astype(jnp.float32),
    )


@jax.jit
def mymodel_head(x, prepared):
    """x: [B, 512] float32 features (backbone output). Returns [B, NUM_CLASSES] f32."""
    w1, b1, w2, b2, w3p, b3p = prepared
    B = x.shape[0]

    # Sublane minimum: only pad when B < 8 (negligible; typical batches skip this).
    if B < 8:
        x = jnp.zeros((8, F_IN), x.dtype).at[:B].set(x)
    Br = x.shape[0]

    # Batch tile: multiple of 8, capped at TB_MAX, targeting >= 4 grid steps at
    # large B so the "parallel" axis shards across v7x's two TensorCores and
    # the x-load / compute / out-store pipeline has steps to overlap.
    tb = max(8, min(TB_MAX, _round_up(pl.cdiv(Br, 4), 8)))
    grid = (pl.cdiv(Br, tb),)

    # Output rows rounded to a sublane multiple; Pallas masks ragged blocks
    # (no zero-padded copy of x is ever materialized).
    out_rows = _round_up(Br, 8)

    const = lambda shape: pl.BlockSpec(shape, lambda i: (0, 0))

    out = pl.pallas_call(
        mlp_head_kernel,
        out_shape=jax.ShapeDtypeStruct((out_rows, OUT_PAD), jnp.bfloat16),
        grid_spec=pl.GridSpec(
            grid=grid,
            in_specs=[
                pl.BlockSpec((tb, F_IN), lambda i: (i, 0)),   # x: tiled over batch
                const((F_IN, H1)), const((1, H1)),            # weights: resident
                const((H1, H2)), const((1, H2)),
                const((H2, OUT_PAD)), const((1, OUT_PAD)),
            ],
            out_specs=pl.BlockSpec((tb, OUT_PAD), lambda i: (i, 0)),
        ),
        compiler_params=pltpu.CompilerParams(
            dimension_semantics=("parallel",),
        ),
    )(x, w1, b1, w2, b2, w3p, b3p)

    return out[:B, :NUM_CLASSES].astype(jnp.float32)


def init_params(key):
    """Deterministic init matching the PyTorch Linear shapes (stored as [in, out])."""
    k1, k2, k3, k4, k5, k6 = jax.random.split(key, 6)

    def lin(kw, kb, fan_in, fan_out):
        bound = 1.0 / jnp.sqrt(fan_in)
        w = jax.random.uniform(kw, (fan_in, fan_out), jnp.float32, -bound, bound)
        b = jax.random.uniform(kb, (fan_out,), jnp.float32, -bound, bound)
        return w, b

    w1, b1 = lin(k1, k2, F_IN, H1)
    w2, b2 = lin(k3, k4, H1, H2)
    w3, b3 = lin(k5, k6, H2, NUM_CLASSES)
    return (w1, b1, w2, b2, w3, b3)


if __name__ == "__main__":
    key = jax.random.PRNGKey(0)
    kx, kp = jax.random.split(key)

    B = 8
    # Backbone output features (512-dim), standing in for backbone(x).
    x = jax.random.normal(kx, (B, F_IN), jnp.float32)
    params = init_params(kp)
    prepared = prepare_params(params)   # one-time padding + bf16 cast

    out = mymodel_head(x, prepared)
    jax.block_until_ready(out)

    # References: one matching the kernel's bf16/f32 precision path (tight,
    # modulo the final bf16 output quantization) and one in full f32 (loose).
    w1, b1, w2, b2, w3, b3 = params

    xb = x.astype(jnp.bfloat16)
    r1 = jnp.maximum(
        jnp.dot(xb, w1.astype(jnp.bfloat16), preferred_element_type=jnp.float32) + b1, 0.0)
    r2 = jnp.maximum(
        jnp.dot(r1.astype(jnp.bfloat16), w2.astype(jnp.bfloat16),
                preferred_element_type=jnp.float32) + b2, 0.0)
    ref_bf16 = jnp.dot(r2.astype(jnp.bfloat16), w3.astype(jnp.bfloat16),
                       preferred_element_type=jnp.float32) + b3

    f1 = jnp.maximum(x @ w1 + b1, 0.0)
    f2 = jnp.maximum(f1 @ w2 + b2, 0.0)
    ref_f32 = f2 @ w3 + b3

    assert out.shape == (B, NUM_CLASSES)
    assert jnp.allclose(out, ref_bf16, atol=1e-2, rtol=1e-2)
    assert jnp.allclose(out, ref_f32, atol=1e-1)

    print("KERNEL_OK")
</pallas_src>

<mosaic_0001>
module attributes {stable_mosaic.version = 11 : i64} {
  func.func @mlp_head_kernel(%arg0: i32, %arg1: memref<8x512xf32, #tpu.memory_space<vmem>>, %arg2: memref<512x256xbf16, #tpu.memory_space<vmem>>, %arg3: memref<1x256xf32, #tpu.memory_space<vmem>>, %arg4: memref<256x128xbf16, #tpu.memory_space<vmem>>, %arg5: memref<1x128xf32, #tpu.memory_space<vmem>>, %arg6: memref<128x128xbf16, #tpu.memory_space<vmem>>, %arg7: memref<1x128xf32, #tpu.memory_space<vmem>>, %arg8: memref<8x128xbf16, #tpu.memory_space<vmem>>) attributes {dimension_semantics = [#tpu.dimension_semantics<parallel>], iteration_bounds = array<i64: 1>, scalar_prefetch = 0 : i64, scratch_operands = 0 : i64, tpu.core_type = #tpu.core_type<tc>, window_params = [{transform_indices = @transform_0, window_bounds = array<i64: 8, 512>}, {pipeline_mode = #tpu.pipeline_mode<synchronous>, transform_indices = @transform_1, window_bounds = array<i64: 512, 256>}, {pipeline_mode = #tpu.pipeline_mode<synchronous>, transform_indices = @transform_2, window_bounds = array<i64: 1, 256>}, {pipeline_mode = #tpu.pipeline_mode<synchronous>, transform_indices = @transform_3, window_bounds = array<i64: 256, 128>}, {pipeline_mode = #tpu.pipeline_mode<synchronous>, transform_indices = @transform_4, window_bounds = array<i64: 1, 128>}, {pipeline_mode = #tpu.pipeline_mode<synchronous>, transform_indices = @transform_5, window_bounds = array<i64: 128, 128>}, {pipeline_mode = #tpu.pipeline_mode<synchronous>, transform_indices = @transform_6, window_bounds = array<i64: 1, 128>}, {transform_indices = @transform_7, window_bounds = array<i64: 8, 128>}]} {
    %c0 = arith.constant 0 : index
    %c0_0 = arith.constant 0 : index
    %0 = vector.load %arg1[%c0, %c0_0] : memref<8x512xf32, #tpu.memory_space<vmem>>, vector<8x512xf32>
    %1 = arith.truncf %0 : vector<8x512xf32> to vector<8x512xbf16>
    %c0_1 = arith.constant 0 : index
    %c0_2 = arith.constant 0 : index
    %2 = vector.load %arg2[%c0_1, %c0_2] : memref<512x256xbf16, #tpu.memory_space<vmem>>, vector<512x256xbf16>
    %cst = arith.constant dense<0.000000e+00> : vector<8x256xf32>
    %3 = tpu.matmul %1, %2, %cst {dimension_numbers = #tpu.dot_dimension_numbers<[1], [0], [0], [1], [0, 0, 1, 1], [], []>} : vector<8x512xbf16>, vector<512x256xbf16>, vector<8x256xf32> -> vector<8x256xf32>
    %c0_3 = arith.constant 0 : index
    %c0_4 = arith.constant 0 : index
    %4 = vector.load %arg3[%c0_3, %c0_4] : memref<1x256xf32, #tpu.memory_space<vmem>>, vector<1x256xf32>
    %5 = vector.broadcast %4 : vector<1x256xf32> to vector<8x256xf32>
    %6 = arith.addf %3, %5 : vector<8x256xf32>
    %cst_5 = arith.constant 0.000000e+00 : f32
    %7 = vector.broadcast %cst_5 : f32 to vector<8x256xf32>
    %8 = arith.maximumf %6, %7 : vector<8x256xf32>
    %9 = arith.truncf %8 : vector<8x256xf32> to vector<8x256xbf16>
    %c0_6 = arith.constant 0 : index
    %c0_7 = arith.constant 0 : index
    %10 = vector.load %arg4[%c0_6, %c0_7] : memref<256x128xbf16, #tpu.memory_space<vmem>>, vector<256x128xbf16>
    %cst_8 = arith.constant dense<0.000000e+00> : vector<8x128xf32>
    %11 = tpu.matmul %9, %10, %cst_8 {dimension_numbers = #tpu.dot_dimension_numbers<[1], [0], [0], [1], [0, 0, 1, 1], [], []>} : vector<8x256xbf16>, vector<256x128xbf16>, vector<8x128xf32> -> vector<8x128xf32>
    %c0_9 = arith.constant 0 : index
    %c0_10 = arith.constant 0 : index
    %12 = vector.load %arg5[%c0_9, %c0_10] : memref<1x128xf32, #tpu.memory_space<vmem>>, vector<1x128xf32>
    %13 = vector.broadcast %12 : vector<1x128xf32> to vector<8x128xf32>
    %14 = arith.addf %11, %13 : vector<8x128xf32>
    %cst_11 = arith.constant 0.000000e+00 : f32
    %15 = vector.broadcast %cst_11 : f32 to vector<8x128xf32>
    %16 = arith.maximumf %14, %15 : vector<8x128xf32>
    %17 = arith.truncf %16 : vector<8x128xf32> to vector<8x128xbf16>
    %c0_12 = arith.constant 0 : index
    %c0_13 = arith.constant 0 : index
    %18 = vector.load %arg6[%c0_12, %c0_13] : memref<128x128xbf16, #tpu.memory_space<vmem>>, vector<128x128xbf16>
    %cst_14 = arith.constant dense<0.000000e+00> : vector<8x128xf32>
    %19 = tpu.matmul %17, %18, %cst_14 {dimension_numbers = #tpu.dot_dimension_numbers<[1], [0], [0], [1], [0, 0, 1, 1], [], []>} : vector<8x128xbf16>, vector<128x128xbf16>, vector<8x128xf32> -> vector<8x128xf32>
    %c0_15 = arith.constant 0 : index
    %c0_16 = arith.constant 0 : index
    %20 = vector.load %arg7[%c0_15, %c0_16] : memref<1x128xf32, #tpu.memory_space<vmem>>, vector<1x128xf32>
    %21 = vector.broadcast %20 : vector<1x128xf32> to vector<8x128xf32>
    %22 = arith.addf %19, %21 : vector<8x128xf32>
    %23 = arith.truncf %22 : vector<8x128xf32> to vector<8x128xbf16>
    %c0_17 = arith.constant 0 : index
    %c0_18 = arith.constant 0 : index
    %24 = vector.load %arg8[%c0_17, %c0_18] : memref<8x128xbf16, #tpu.memory_space<vmem>>, vector<8x128xbf16>
    tpu.vector_store %arg8[%c0_17, %c0_18], %23 {strides = array<i32>} : memref<8x128xbf16, #tpu.memory_space<vmem>>, vector<8x128xbf16>,
    return
  }
  func.func @transform_0(%arg0: i32) -> (i32, i32) {
    %c0_i32 = arith.constant 0 : i32
    %c0_i32_0 = arith.constant 0 : i32
    return %arg0, %c0_i32 : i32, i32
  }
  func.func @transform_1(%arg0: i32) -> (i32, i32) {
    %c0_i32 = arith.constant 0 : i32
    %c0_i32_0 = arith.constant 0 : i32
    %c0_i32_1 = arith.constant 0 : i32
    return %c0_i32, %c0_i32_0 : i32, i32
  }
  func.func @transform_2(%arg0: i32) -> (i32, i32) {
    %c0_i32 = arith.constant 0 : i32
    %c0_i32_0 = arith.constant 0 : i32
    %c0_i32_1 = arith.constant 0 : i32
    return %c0_i32, %c0_i32_0 : i32, i32
  }
  func.func @transform_3(%arg0: i32) -> (i32, i32) {
    %c0_i32 = arith.constant 0 : i32
    %c0_i32_0 = arith.constant 0 : i32
    %c0_i32_1 = arith.constant 0 : i32
    return %c0_i32, %c0_i32_0 : i32, i32
  }
  func.func @transform_4(%arg0: i32) -> (i32, i32) {
    %c0_i32 = arith.constant 0 : i32
    %c0_i32_0 = arith.constant 0 : i32
    %c0_i32_1 = arith.constant 0 : i32
    return %c0_i32, %c0_i32_0 : i32, i32
  }
  func.func @transform_5(%arg0: i32) -> (i32, i32) {
    %c0_i32 = arith.constant 0 : i32
    %c0_i32_0 = arith.constant 0 : i32
    %c0_i32_1 = arith.constant 0 : i32
    return %c0_i32, %c0_i32_0 : i32, i32
  }
  func.func @transform_6(%arg0: i32) -> (i32, i32) {
    %c0_i32 = arith.constant 0 : i32
    %c0_i32_0 = arith.constant 0 : i32
    %c0_i32_1 = arith.constant 0 : i32
    return %c0_i32, %c0_i32_0 : i32, i32
  }
  func.func @transform_7(%arg0: i32) -> (i32, i32) {
    %c0_i32 = arith.constant 0 : i32
    %c0_i32_0 = arith.constant 0 : i32
    return %arg0, %c0_i32 : i32, i32
  }
}

</mosaic_0001>

<bundles_post_ra>
// kernel: mymodel_head.1
= control target key start
LH: loop header
LB: loop body
LE: loop exit
PB: predicated region body
PF: predicated region fallthrough
CT: control target
= control target key end

     0   :  { %12 = vsyncpa [#allocation3], 0  ;;  %s1348_s0 = inlined_call_operand.hbm [shape: f32[8,512], index: 0, kind: input, shape index: {}]   ;;  %s1349_s1 = inlined_call_operand.hbm [shape: bf16[512,256], index: 1, kind: input, shape index: {}]   ;;  %s1350_s2 = inlined_call_operand.vmem [shape: f32[1,256], index: 2, kind: input, shape index: {}]   ;;  %s1351_s3 = inlined_call_operand.hbm [shape: bf16[256,128], index: 3, kind: input, shape index: {}]   ;;  %s1352_s4 = inlined_call_operand.vmem [shape: f32[1,128], index: 4, kind: input, shape index: {}]   ;;  %s1353_s5 = inlined_call_operand.hbm [shape: bf16[128,128], index: 5, kind: input, shape index: {}]   ;;  %s1354_s6 = inlined_call_operand.vmem [shape: f32[1,128], index: 6, kind: input, shape index: {}]   ;;  %s1355_s7 = inlined_call_operand.vmem [shape: bf16[8,128], index: 7, kind: output, shape index: {}]  }
   0x1   :  { %13 = vsyncpa [#allocation5], 0 }
   0x2   :  { %14 = vsyncpa [#allocation8], 0  ;;  %s1238_s24 = smov [#allocation4]   ;;  %s1144_s28 = scalar_lea.hbm %s1349_s1, 8192 }
   0x3   :  { %s30_s25 = sshll.u32 %s1238_s24, 4  ;;  %p1145_p0 = scmp.ne.s32.totalorder %s1349_s1, %s1144_s28  ;;  %s31_s25 = int_to_ptr.vmem [resolvable:$true] %s30_s25 }
   0x4   :  { %p1148_p1 = scmp.lt.u32.totalorder %s1144_s28, %s1349_s1 }
   0x6   :  { %p1150_p2 = pnand %p1148_p1, %p1145_p0 }
   0x8   :  { %1153 = shalt.err (!%p1150_p2)
}
   0x9   :  { %s1154_s10 = scalar_lea.vmem %s31_s25, 8192  ;;  %p1159_p4 = scmp.lt.s32.totalorder %s31_s25, %s31_s25 }
   0xa   :  { %p1155_p3 = scmp.ne.s32.totalorder %s31_s25, %s1154_s10  ;;  %p1160_p5 = scmp.lt.s32.totalorder %s1154_s10, %s1154_s10 }
   0xc   :  { %p1161_p6 = por %p1160_p5, %p1159_p4 }
   0xe   :  { %p1162_p7 = pnand %p1161_p6, %p1155_p3 }
  0x10   :  { %1165 = shalt.err (!%p1162_p7)
}
  0x11   :  { %s1239_s11 = smov 128   ;;  %s1240_s12 = smov 8  }
  0x12   :  { %36 = dma.hbm_to_vmem [thread:$0]  %s1349_s1, 8192, %s31_s25, [#allocation5], %s1239_s11, %s1239_s11, %s1240_s12  }
  0x13   :  { %s1241_s15 = smov [#allocation2]   ;;  %s1242_s17 = smov [#allocation6]  }
  0x14   :  { %s21_s16 = sshll.u32 %s1241_s15, 4  ;;  %s44_s18 = sshll.u32 %s1242_s17, 4  ;;  %s22_s16 = int_to_ptr.vmem [resolvable:$true] %s21_s16  ;;  %s45_s18 = int_to_ptr.vmem [resolvable:$true] %s44_s18 }
  0x15   :  { %s1166_s21 = scalar_lea.hbm %s1348_s0, 512 }
  0x16   :  { %p1167_p8 = scmp.ne.s32.totalorder %s1348_s0, %s1166_s21  ;;  %p1170_p9 = scmp.lt.u32.totalorder %s1166_s21, %s1348_s0 }
  0x18   :  { %p1172_p10 = pnand %p1170_p9, %p1167_p8 }
  0x1a   :  { %1175 = shalt.err (!%p1172_p10)
}
  0x1b   :  { %s1176_s1 = scalar_lea.vmem %s22_s16, 512  ;;  %p1181_p12 = scmp.lt.s32.totalorder %s22_s16, %s22_s16 }
  0x1c   :  { %p1177_p11 = scmp.ne.s32.totalorder %s22_s16, %s1176_s1  ;;  %p1182_p13 = scmp.lt.s32.totalorder %s1176_s1, %s1176_s1 }
  0x1e   :  { %p1183_p0 = por %p1182_p13, %p1181_p12 }
  0x20   :  { %p1184_p1 = pnand %p1183_p0, %p1177_p11 }
  0x22   :  { %1187 = shalt.err (!%p1184_p1)
}
  0x23   :  { %24 = dma.hbm_to_vmem [thread:$0]  %s1348_s0, 512, %s22_s16, [#allocation3]  }
  0x24   :  { %s1188_s30 = scalar_lea.hbm %s1351_s3, 2048 }
  0x25   :  { %p1189_p2 = scmp.ne.s32.totalorder %s1351_s3, %s1188_s30  ;;  %p1192_p3 = scmp.lt.u32.totalorder %s1188_s30, %s1351_s3 }
  0x27   :  { %p1194_p4 = pnand %p1192_p3, %p1189_p2 }
  0x29   :  { %1197 = shalt.err (!%p1194_p4)
}
  0x2a   :  { %s1198_s12 = scalar_lea.vmem %s45_s18, 2048  ;;  %p1203_p6 = scmp.lt.s32.totalorder %s45_s18, %s45_s18 }
  0x2b   :  { %p1199_p5 = scmp.ne.s32.totalorder %s45_s18, %s1198_s12  ;;  %p1204_p7 = scmp.lt.s32.totalorder %s1198_s12, %s1198_s12 }
  0x2d   :  { %p1205_p8 = por %p1204_p7, %p1203_p6 }
  0x2f   :  { %p1206_p9 = pnand %p1205_p8, %p1199_p5 }
  0x31   :  { %1209 = shalt.err (!%p1206_p9)
}
  0x32   :  { %s1243_s0 = smov 64   ;;  %s1244_s13 = smov 4  }
  0x33   :  { %50 = dma.hbm_to_vmem [thread:$0]  %s1351_s3, 2048, %s45_s18, [#allocation5], %s1243_s0, %s1243_s0, %s1244_s13  }
  0x34   :  { %s1245_s16 = smov [#allocation7]   ;;  %s1210_s21 = scalar_lea.hbm %s1353_s5, 1024 }
  0x35   :  { %s58_s17 = sshll.u32 %s1245_s16, 4  ;;  %p1211_p10 = scmp.ne.s32.totalorder %s1353_s5, %s1210_s21  ;;  %s59_s17 = int_to_ptr.vmem [resolvable:$true] %s58_s17 }
  0x36   :  { %p1214_p11 = scmp.lt.u32.totalorder %s1210_s21, %s1353_s5 }
  0x38   :  { %p1216_p12 = pnand %p1214_p11, %p1211_p10 }
  0x3a   :  { %1219 = shalt.err (!%p1216_p12)
}
  0x3b   :  { %s1220_s1 = scalar_lea.vmem %s59_s17, 1024  ;;  %p1225_p0 = scmp.lt.s32.totalorder %s59_s17, %s59_s17 }
  0x3c   :  { %p1221_p13 = scmp.ne.s32.totalorder %s59_s17, %s1220_s1  ;;  %p1226_p1 = scmp.lt.s32.totalorder %s1220_s1, %s1220_s1 }
  0x3e   :  { %p1227_p2 = por %p1226_p1, %p1225_p0 }
  0x40   :  { %p1228_p3 = pnand %p1227_p2, %p1221_p13 }
  0x42   :  { %1231 = shalt.err (!%p1228_p3)
}
  0x43   :  { %64 = dma.hbm_to_vmem [thread:$0]  %s1353_s5, 1024, %s59_s17, [#allocation8], %s1243_s0, %s1243_s0, %s1244_s13  }
  0x44   :  { %1232 = dma.done.wait [#allocation3], 512  }
  0x45   :  { %1233 = vsyncadd [#allocation3], 4294966784 }
  0x46   :  { %1234 = dma.done.wait [#allocation5], 10240  }
  0x47   :  { %1235 = vsyncadd [#allocation5], 4294957056 }
  0x48   :  { %1236 = dma.done.wait [#allocation8], 1024  }
  0x49   :  { %1237 = vsyncadd [#allocation8], 4294966272  ;;  %v1024_v0 = vld [vmem:[#allocation4 + $0x4] ss:$8 sps:$4 sm:$0xff]   ;;  %v1026_v1 = vld [vmem:[#allocation4] ss:$8 sps:$4 sm:$0xff]  }
  0x4a   :  { %484 = vmatprep.subr.bf16.mxu0 %v1024_v0  ;;  %v1027_v2 = vld [vmem:[#allocation4 + $0x14] ss:$8 sps:$4 sm:$0xff]   ;;  %v1029_v3 = vld [vmem:[#allocation4 + $0x10] ss:$8 sps:$4 sm:$0xff]   ;;  %v1030_v4 = vld [vmem:[#allocation4 + $0x24] ss:$8 sps:$4 sm:$0xff]  }
  0x4b   :  { %485 = vmatpush1.bf16.msra.mxu0 %v1026_v1  ;;  %v1032_v5 = vld [vmem:[#allocation4 + $0x20] ss:$8 sps:$4 sm:$0xff]   ;;  %v1033_v6 = vld [vmem:[#allocation4 + $0x34] ss:$8 sps:$4 sm:$0xff]   ;;  %v1035_v7 = vld [vmem:[#allocation4 + $0x30] ss:$8 sps:$4 sm:$0xff]  }
  0x4c   :  { %486 = vmatprep.subr.bf16.mxu0 %v1027_v2  ;;  %v1036_v8 = vld [vmem:[#allocation4 + $0x44] ss:$8 sps:$4 sm:$0xff]   ;;  %v1038_v9 = vld [vmem:[#allocation4 + $0x40] ss:$8 sps:$4 sm:$0xff]   ;;  %v1039_v10 = vld [vmem:[#allocation4 + $0x54] ss:$8 sps:$4 sm:$0xff]  }
  0x4d   :  { %v1041_v11 = vld [vmem:[#allocation4 + $0x50] ss:$8 sps:$4 sm:$0xff]   ;;  %v1042_v12 = vld [vmem:[#allocation4 + $0x64] ss:$8 sps:$4 sm:$0xff]   ;;  %v1044_v15 = vld [vmem:[#allocation4 + $0x60] ss:$8 sps:$4 sm:$0xff]  }
  0x4e   :  { %v81_v13 = vld [vmem:[#allocation2 + $0x8] sm:$0xff]  ;;  %v1045_v16 = vld [vmem:[#allocation4 + $0x74] ss:$8 sps:$4 sm:$0xff]   ;;  %v1047_v17 = vld [vmem:[#allocation4 + $0x70] ss:$8 sps:$4 sm:$0xff]   ;;  %vm1247_vm0 = vmmov 0  }
  0x4f   :  { %487 = vmatpush1.bf16.msra.mxu0 %v1029_v3  ;;  %v85_v14 = vpack.c.bf16 %v81_v13, %v81_v13  ;;  %v1048_v18 = vld [vmem:[#allocation4 + $0x84] ss:$8 sps:$4 sm:$0xff]   ;;  %v1050_v19 = vld [vmem:[#allocation4 + $0x80] ss:$8 sps:$4 sm:$0xff]   ;;  %v1051_v20 = vld [vmem:[#allocation4 + $0x94] ss:$8 sps:$4 sm:$0xff]  }
  0x50   :  { %488 = vmatprep.subr.bf16.mxu0 %v1030_v4  ;;  %v1053_v21 = vld [vmem:[#allocation4 + $0x90] ss:$8 sps:$4 sm:$0xff]   ;;  %v1054_v22 = vld [vmem:[#allocation4 + $0xa4] ss:$8 sps:$4 sm:$0xff]   ;;  %v1056_v23 = vld [vmem:[#allocation4 + $0xa0] ss:$8 sps:$4 sm:$0xff]  }
  0x51   :  { %516 = vmatprep.mubr.bf16.mxu0 %v85_v14  ;;  %v1057_v24 = vld [vmem:[#allocation4 + $0xb4] ss:$8 sps:$4 sm:$0xff]   ;;  %v1059_v25 = vld [vmem:[#allocation4 + $0xb0] ss:$8 sps:$4 sm:$0xff]   ;;  %v1060_v26 = vld [vmem:[#allocation4 + $0xc4] ss:$8 sps:$4 sm:$0xff]  }
  0x52   :  { %v1120_v27 = vld [vmem:[#allocation6 + $0x40] sm:$0xff]   ;;  %v1063_v30 = vld [vmem:[#allocation4 + $0xd4] ss:$8 sps:$4 sm:$0xff]   ;;  %v1122_v31 = vld [vmem:[#allocation6 + $0x48] sm:$0xff]  }
  0x53   :  { %489 = vmatpush1.bf16.msra.mxu0 %v1032_v5  ;;  %v1062_v28 = vld [vmem:[#allocation4 + $0xc0] ss:$8 sps:$4 sm:$0xff]   ;;  %957 = vmatprep.subr.bf16.mxu1 %v1120_v27  ;;  %v1124_v33 = vld [vmem:[#allocation6 + $0x50] sm:$0xff]   ;;  %v1066_v35 = vld [vmem:[#allocation4 + $0xe4] ss:$8 sps:$4 sm:$0xff]  }
  0x54   :  { %490 = vmatprep.subr.bf16.mxu0 %v1033_v6  ;;  %v1121_v29 = vld [vmem:[#allocation6] sm:$0xff]   ;;  %v1123_v32 = vld [vmem:[#allocation6 + $0x8] sm:$0xff]   ;;  %v1065_v34 = vld [vmem:[#allocation4 + $0xd0] ss:$8 sps:$4 sm:$0xff]  }
  0x55   :  { %958 = vmatpush3.bf16.msra.mxu1 %v1121_v29  ;;  %v1125_v36 = vld [vmem:[#allocation6 + $0x10] sm:$0xff]   ;;  %v1126_v37 = vld [vmem:[#allocation6 + $0x58] sm:$0xff]   ;;  %v1068_v38 = vld [vmem:[#allocation4 + $0xe0] ss:$8 sps:$4 sm:$0xff]  }
  0x56   :  { %959 = vmatprep.subr.bf16.mxu1 %v1122_v31  ;;  %v1069_v39 = vld [vmem:[#allocation4 + $0xf4] ss:$8 sps:$4 sm:$0xff]   ;;  %v1128_v41 = vld [vmem:[#allocation6 + $0x60] sm:$0xff]   ;;  %v1071_v42 = vld [vmem:[#allocation4 + $0xf0] ss:$8 sps:$4 sm:$0xff]  }
  0x57   :  { %491 = vmatpush1.bf16.msra.mxu0 %v1035_v7  ;;  %v1127_v40 = vld [vmem:[#allocation6 + $0x18] sm:$0xff]   ;;  %v80_v43 = vld [vmem:[#allocation2] sm:$0xff]  ;;  %v1130_v47 = vld [vmem:[#allocation6 + $0x68] sm:$0xff]  }
  0x58   :  { %492 = vmatprep.subr.bf16.mxu0 %v1036_v8  ;;  %v1129_v44 = vld [vmem:[#allocation6 + $0x20] sm:$0xff]   ;;  %v83_v46 = vld [vmem:[#allocation2 + $0x18] sm:$0xff]  ;;  %v84_v49 = vpack.c.bf16 %v80_v43, %v80_v43  ;;  %v1131_v52 = vld [vmem:[#allocation6 + $0x28] sm:$0xff]  }
  0x59   :  { %960 = vmatpush3.bf16.msra.mxu1 %v1123_v32  ;;  %v1074_v45 = vld [vmem:[#allocation4 + $0x104] ss:$8 sps:$4 sm:$0xff]   ;;  %v1072_v48 = vld [vmem:[#allocation4 + $0x100] ss:$8 sps:$4 sm:$0xff]   ;;  %v87_v50 = vpack.c.bf16 %v83_v46, %v83_v46  ;;  %v1077_v51 = vld [vmem:[#allocation4 + $0x114] ss:$8 sps:$4 sm:$0xff]  }
  0x5a   :  { %961 = vmatprep.subr.bf16.mxu1 %v1124_v33  ;;  %v1075_v53 = vld [vmem:[#allocation4 + $0x110] ss:$8 sps:$4 sm:$0xff]   ;;  %v1080_v54 = vld [vmem:[#allocation4 + $0x124] ss:$8 sps:$4 sm:$0xff]   ;;  %v1078_v55 = vld [vmem:[#allocation4 + $0x120] ss:$8 sps:$4 sm:$0xff]  }
  0x5b   :  { %493 = vmatpush1.bf16.msra.mxu0 %v1038_v9  ;;  %v1083_v56 = vld [vmem:[#allocation4 + $0x134] ss:$8 sps:$4 sm:$0xff]   ;;  %v1081_v57 = vld [vmem:[#allocation4 + $0x130] ss:$8 sps:$4 sm:$0xff]   ;;  %v1086_v58 = vld [vmem:[#allocation4 + $0x144] ss:$8 sps:$4 sm:$0xff]  }
  0x5c   :  { %494 = vmatprep.subr.bf16.mxu0 %v1039_v10  ;;  %v1084_v59 = vld [vmem:[#allocation4 + $0x140] ss:$8 sps:$4 sm:$0xff]   ;;  %v1089_v60 = vld [vmem:[#allocation4 + $0x154] ss:$8 sps:$4 sm:$0xff]   ;;  %v1087_v61 = vld [vmem:[#allocation4 + $0x150] ss:$8 sps:$4 sm:$0xff]  }
  0x5d   :  { %962 = vmatpush3.bf16.msra.mxu1 %v1125_v36  ;;  %v1092_v62 = vld [vmem:[#allocation4 + $0x164] ss:$8 sps:$4 sm:$0xff]   ;;  %v1090_v63 = vld [vmem:[#allocation4 + $0x160] ss:$8 sps:$4 sm:$0xff]   ;;  %v1095_v0 = vld [vmem:[#allocation4 + $0x174] ss:$8 sps:$4 sm:$0xff]  }
  0x5e   :  { %963 = vmatprep.subr.bf16.mxu1 %v1126_v37  ;;  %v1093_v1 = vld [vmem:[#allocation4 + $0x170] ss:$8 sps:$4 sm:$0xff]   ;;  %v1098_v2 = vld [vmem:[#allocation4 + $0x184] ss:$8 sps:$4 sm:$0xff]   ;;  %v1096_v3 = vld [vmem:[#allocation4 + $0x180] ss:$8 sps:$4 sm:$0xff]  }
  0x5f   :  { %495 = vmatpush1.bf16.msra.mxu0 %v1041_v11  ;;  %v1101_v4 = vld [vmem:[#allocation4 + $0x194] ss:$8 sps:$4 sm:$0xff]   ;;  %v1099_v5 = vld [vmem:[#allocation4 + $0x190] ss:$8 sps:$4 sm:$0xff]   ;;  %v1104_v6 = vld [vmem:[#allocation4 + $0x1a4] ss:$8 sps:$4 sm:$0xff]  }
  0x60   :  { %496 = vmatprep.subr.bf16.mxu0 %v1042_v12  ;;  %v1102_v7 = vld [vmem:[#allocation4 + $0x1a0] ss:$8 sps:$4 sm:$0xff]   ;;  %v1107_v8 = vld [vmem:[#allocation4 + $0x1b4] ss:$8 sps:$4 sm:$0xff]   ;;  %v1105_v9 = vld [vmem:[#allocation4 + $0x1b0] ss:$8 sps:$4 sm:$0xff]  }
  0x61   :  { %964 = vmatpush3.bf16.msra.mxu1 %v1127_v40  ;;  %v1110_v10 = vld [vmem:[#allocation4 + $0x1c4] ss:$8 sps:$4 sm:$0xff]   ;;  %v1108_v11 = vld [vmem:[#allocation4 + $0x1c0] ss:$8 sps:$4 sm:$0xff]   ;;  %v1113_v12 = vld [vmem:[#allocation4 + $0x1d4] ss:$8 sps:$4 sm:$0xff]  }
  0x62   :  { %965 = vmatprep.subr.bf16.mxu1 %v1128_v41  ;;  %v1111_v13 = vld [vmem:[#allocation4 + $0x1d0] ss:$8 sps:$4 sm:$0xff]   ;;  %v1116_v14 = vld [vmem:[#allocation4 + $0x1e4] ss:$8 sps:$4 sm:$0xff]  }
  0x63   :  { %497 = vmatpush1.bf16.msra.mxu0 %v1044_v15  ;;  %v1114_v15 = vld [vmem:[#allocation4 + $0x1e0] ss:$8 sps:$4 sm:$0xff]  }
  0x64   :  { %498 = vmatprep.subr.bf16.mxu0 %v1045_v16  ;;  %v1119_v16 = vld [vmem:[#allocation4 + $0x1f4] ss:$8 sps:$4 sm:$0xff]   ;;  %v1136_v41 = vld [vmem:[#allocation7] sm:$0xff]   ;;  %v1137_v43 = vld [vmem:[#allocation7 + $0x8] sm:$0xff]  }
  0x65   :  { %966 = vmatpush3.bf16.msra.mxu1 %v1129_v44  ;;  %v1138_v44 = vld [vmem:[#allocation7 + $0x10] sm:$0xff]   ;;  %v1140_v46 = vld [vmem:[#allocation7 + $0x20] sm:$0xff]  }
  0x66   :  { %967 = vmatprep.subr.bf16.mxu1 %v1130_v47  ;;  %v1141_v47 = vld [vmem:[#allocation7 + $0x28] sm:$0xff]  }
  0x67   :  { %499 = vmatpush1.bf16.msra.mxu0 %v1047_v17  ;;  %v1117_v17 = vld [vmem:[#allocation4 + $0x1f0] ss:$8 sps:$4 sm:$0xff]  }
  0x68   :  { %500 = vmatprep.subr.bf16.mxu0 %v1048_v18  ;;  %v82_v18 = vld [vmem:[#allocation2 + $0x10] sm:$0xff] }
  0x69   :  { %968 = vmatpush3.bf16.msra.mxu1 %v1131_v52 }
  0x6b   :  { %501 = vmatpush1.bf16.msra.mxu0 %v1050_v19  ;;  %v86_v19 = vpack.c.bf16 %v82_v18, %v82_v18 }
  0x6c   :  { %502 = vmatprep.subr.bf16.mxu0 %v1051_v20  ;;  %v1132_v20 = vld [vmem:[#allocation6 + $0x70] sm:$0xff]  }
  0x6d   :  { %969 = vmatprep.subr.bf16.mxu1 %v1132_v20 }
  0x6f   :  { %503 = vmatpush1.bf16.msra.mxu0 %v1053_v21  ;;  %v1133_v21 = vld [vmem:[#allocation6 + $0x30] sm:$0xff]  }
  0x70   :  { %504 = vmatprep.subr.bf16.mxu0 %v1054_v22  ;;  %970 = vmatpush3.bf16.msra.mxu1 %v1133_v21  ;;  %v1134_v22 = vld [vmem:[#allocation6 + $0x78] sm:$0xff]  }
  0x71   :  { %971 = vmatprep.subr.bf16.mxu1 %v1134_v22 }
  0x73   :  { %505 = vmatpush1.bf16.msra.mxu0 %v1056_v23  ;;  %v1135_v23 = vld [vmem:[#allocation6 + $0x38] sm:$0xff]  }
  0x74   :  { %506 = vmatprep.subr.bf16.mxu0 %v1057_v24  ;;  %972 = vmatpush3.bf16.msra.mxu1 %v1135_v23  ;;  %v1246_v24 = vmov 0.0  }
  0x75   :  { %988 = vmatprep.subr.bf16.mxu1 %v1246_v24 }
  0x77   :  { %507 = vmatpush1.bf16.msra.mxu0 %v1059_v25  ;;  %v154_v25 = vlaneseq }
  0x78   :  { %508 = vmatprep.subr.bf16.mxu0 %v1060_v26 }
  0x79   :  { %v155_v26 = vshrl.u32 %v154_v25, 7 }
  0x7b   :  { %509 = vmatpush1.bf16.msra.mxu0 %v1062_v28  ;;  %v156_v27 = vsub.s32 0, %v155_v26  ;;  %v152_v28 = vld [vmem:[%s1350_s2] sm:$0x3]  ;;  %v160_v29 = vsub.s32 1, %v155_v26 }
  0x7c   :  { %510 = vmatprep.subr.bf16.mxu0 %v1063_v30 }
  0x7d   :  { %v157_v30 = vrot.slane %v152_v28, %v156_v27  ;;  %v161_v31 = vrot.slane %v152_v28, %v160_v29 }
  0x7f   :  { %511 = vmatpush1.bf16.msra.mxu0 %v1065_v34 }
  0x80   :  { %512 = vmatprep.subr.bf16.mxu0 %v1066_v35 }
  0x83   :  { %513 = vmatpush1.bf16.msra.mxu0 %v1068_v38 }
  0x84   :  { %514 = vmatprep.subr.bf16.mxu0 %v1069_v39 }
  0x87   :  { %515 = vmatpush1.bf16.msra.mxu0 %v1071_v42 }
  0x88   :  { %525 = vmatprep.subr.bf16.mxu0 %v1074_v45  ;;  %v1139_v45 = vld [vmem:[#allocation7 + $0x18] sm:$0xff]  }
  0x8a   :  { %517 = vmatmul.mubr.bf16.vlgmr.msra.gmra.mrb[0].mxu0 %v84_v49  ;;  %v1143_v49 = vld [vmem:[#allocation7 + $0x38] sm:$0xff]  }
  0x8b   :  { %526 = vmatpush1.bf16.msra.mxu0 %v1072_v48  ;;  %557 = vmatprep.mubr.bf16.mxu0 %v87_v50  ;;  %v1142_v48 = vld [vmem:[#allocation7 + $0x30] sm:$0xff]  }
  0x8c   :  { %527 = vmatprep.subr.bf16.mxu0 %v1077_v51  ;;  %v931_v51 = vld [vmem:[%s1352_s4] ss:$0 sm:$0xff] }
  0x8f   :  { %528 = vmatpush1.bf16.msra.mxu0 %v1075_v53 }
  0x90   :  { %529 = vmatprep.subr.bf16.mxu0 %v1080_v54 }
  0x93   :  { %530 = vmatpush1.bf16.msra.mxu0 %v1078_v55 }
  0x94   :  { %531 = vmatprep.subr.bf16.mxu0 %v1083_v56 }
  0x97   :  { %532 = vmatpush1.bf16.msra.mxu0 %v1081_v57 }
  0x98   :  { %533 = vmatprep.subr.bf16.mxu0 %v1086_v58 }
  0x9b   :  { %534 = vmatpush1.bf16.msra.mxu0 %v1084_v59  ;;  %v948_v59 = vld [vmem:[%s1354_s6] ss:$0 sm:$0xff] }
  0x9c   :  { %535 = vmatprep.subr.bf16.mxu0 %v1089_v60 }
  0x9f   :  { %536 = vmatpush1.bf16.msra.mxu0 %v1087_v61 }
  0xa0   :  { %537 = vmatprep.subr.bf16.mxu0 %v1092_v62 }
  0xa3   :  { %538 = vmatpush1.bf16.msra.mxu0 %v1090_v63 }
  0xa4   :  { %539 = vmatprep.subr.bf16.mxu0 %v1095_v0 }
  0xa7   :  { %540 = vmatpush1.bf16.msra.mxu0 %v1093_v1 }
  0xa8   :  { %541 = vmatprep.subr.bf16.mxu0 %v1098_v2 }
  0xab   :  { %542 = vmatpush1.bf16.msra.mxu0 %v1096_v3 }
  0xac   :  { %543 = vmatprep.subr.bf16.mxu0 %v1101_v4 }
  0xaf   :  { %544 = vmatpush1.bf16.msra.mxu0 %v1099_v5 }
  0xb0   :  { %545 = vmatprep.subr.bf16.mxu0 %v1104_v6 }
  0xb3   :  { %546 = vmatpush1.bf16.msra.mxu0 %v1102_v7 }
  0xb4   :  { %547 = vmatprep.subr.bf16.mxu0 %v1107_v8 }
  0xb7   :  { %548 = vmatpush1.bf16.msra.mxu0 %v1105_v9 }
  0xb8   :  { %549 = vmatprep.subr.bf16.mxu0 %v1110_v10 }
  0xbb   :  { %550 = vmatpush1.bf16.msra.mxu0 %v1108_v11 }
  0xbc   :  { %551 = vmatprep.subr.bf16.mxu0 %v1113_v12 }
  0xbf   :  { %552 = vmatpush1.bf16.msra.mxu0 %v1111_v13 }
  0xc0   :  { %553 = vmatprep.subr.bf16.mxu0 %v1116_v14 }
  0xc3   :  { %554 = vmatpush1.bf16.msra.mxu0 %v1114_v15 }
  0xc4   :  { %555 = vmatprep.subr.bf16.mxu0 %v1119_v16 }
  0xc7   :  { %556 = vmatpush1.bf16.msra.mxu0 %v1117_v17 }
  0xca   :  { %558 = vmatmul.mubr.bf16.vlgmr.msra.gmra.mrb[0].mxu0 %v86_v19 }
 0x19d   :  { %v559_v32 = vpop.f32.mrb[0].mxu0 }
 0x19e   :  { %v1008_v33 = vadd.f32 %v559_v32, %v157_v30  ;;  %v561_v34 = vpop.f32.mrb[1].mxu0 }
 0x19f   :  { %v1009_v35 = vadd.f32 %v561_v34, %v161_v31  ;;  %v563_v36 = vpop.f32.mrb[2].mxu0 }
 0x1a0   :  { %v566_v37 = vmax.f32 %v1008_v33, 0.0  ;;  %v564_v38 = vpop.f32.mrb[3].mxu0 }
 0x1a1   :  { %v567_v39 = vmax.f32 %v1009_v35, 0.0 }
 0x1a2   :  { %v568_v42 = vpack.c.bf16 %v566_v37, %v566_v37 }
 0x1a3   :  { %v569_v40 = vpack.c.bf16 %v567_v39, %v567_v39 }
 0x1a5   :  { %737 = vmatprep.mubr.bf16.mxu1 %v569_v40 }
 0x1a6   :  { %738 = vmatmul.mubr.bf16.vlgmr.msra.gmra.mrb[0].mxu1 %v568_v42 }
 0x1a7   :  { %989 = vmatpush3.bf16.msra.mxu1 %v1136_v41  ;;  %1004 = vmatprep.mubr.msk.bf16.mxu1 %vm1247_vm0, %v1246_v24 }
 0x1a8   :  { %990 = vmatprep.subr.bf16.mxu1 %v1246_v24 }
 0x1ab   :  { %991 = vmatpush3.bf16.msra.mxu1 %v1137_v43 }
 0x1ac   :  { %992 = vmatprep.subr.bf16.mxu1 %v1246_v24 }
 0x1af   :  { %993 = vmatpush3.bf16.msra.mxu1 %v1138_v44 }
 0x1b0   :  { %994 = vmatprep.subr.bf16.mxu1 %v1246_v24 }
 0x1b3   :  { %995 = vmatpush3.bf16.msra.mxu1 %v1139_v45 }
 0x1b4   :  { %996 = vmatprep.subr.bf16.mxu1 %v1246_v24 }
 0x1b7   :  { %997 = vmatpush3.bf16.msra.mxu1 %v1140_v46 }
 0x1b8   :  { %998 = vmatprep.subr.bf16.mxu1 %v1246_v24 }
 0x1bb   :  { %999 = vmatpush3.bf16.msra.mxu1 %v1141_v47 }
 0x1bc   :  { %1000 = vmatprep.subr.bf16.mxu1 %v1246_v24 }
 0x1bf   :  { %1001 = vmatpush3.bf16.msra.mxu1 %v1142_v48 }
 0x1c0   :  { %1002 = vmatprep.subr.bf16.mxu1 %v1246_v24 }
 0x1c3   :  { %1003 = vmatpush3.bf16.msra.mxu1 %v1143_v49 }
 0x279   :  { %v973_v50 = vpop.f32.mrb[0].mxu1 }
 0x27a   :  { %v974_v52 = vpop.f32.mrb[1].mxu1 }
 0x27b   :  { %v975_v53 = vadd.f32 %v974_v52, %v973_v50  ;;  %v976_v54 = vpop.f32.mrb[2].mxu1 }
 0x27c   :  { %v977_v55 = vpop.f32.mrb[3].mxu1 }
 0x27d   :  { %v740_v56 = vadd.f32 %v975_v53, %v931_v51 }
 0x27f   :  { %v745_v57 = vmax.f32 %v740_v56, 0.0 }
 0x281   :  { %v746_v58 = vpack.c.bf16 %v745_v57, %v745_v57 }
 0x283   :  { %1005 = vmatmul.mubr.bf16.vlgmr.msra.gmra.mrb[4].mxu1 %v746_v58 }
 0x356   :  { %v852_v60 = vpop.f32.mrb[4].mxu1 }
 0x357   :  { %v853_v61 = vadd.f32 %v948_v59, %v852_v60  ;;  %v1006_v62 = vpop.f32.mrb[5].mxu1 }
 0x358   :  { %v855_v63 = vpop.f32.mrb[6].mxu1 }
 0x359   :  { %v858_v0 = vpack.c.bf16 %v853_v61, %v853_v61  ;;  %v1007_v1 = vpop.f32.mrb[7].mxu1 }
 0x35b   :  { %859 = vst [vmem:[%s1355_s7] sm:$0xf] %v858_v0 }
 0x35c   :  { %864 = vsyncpa [#allocation3], 1 }
 0x35d   :  { %865 = vsyncpa [#allocation5], 1 }
 0x35e   :  { %866 = vsyncpa [#allocation8], 1 }

</bundles_post_ra>
